<compile_context>
chip_gen: v6e
topology: v6e:2x2x1
jax: 0.10.0
libtpu: 0.0.40
codegen_flags: <defaults>
</compile_context>

<pallas_src>
import math

import jax
import jax.numpy as jnp
from jax.experimental import pallas as pl
from jax.experimental.pallas import tpu as pltpu

_LANE_CHOICES = (2048, 1024, 512, 256, 128)  # widest lane-dense view dividing the size
_TARGET_BLOCK_BYTES = 4 * 1024 * 1024        # ~4 MiB blocks: near-roofline streaming
_MIN_GRID_STEPS = 4                          # keep both v7x TensorCores fed
_SUBLANE_MIN = {1: 32, 2: 16, 4: 8}          # min sublane tile per dtype itemsize


def _lsb_forward_kernel(x_ref, o_ref):
    # out = pixel >> 1 (== the reference's int(format(p,'08b')[:-1], 2) after the
    # text bit is spliced in and immediately discarded).  Upcast to int32 in
    # registers for a portable shift, then cast back to the storage dtype so HBM
    # traffic stays at the native width.
    o_ref[...] = (x_ref[...].astype(jnp.int32) >> 1).astype(o_ref.dtype)


def _round_up(x, m):
    return ((x + m - 1) // m) * m


def _shift_2d(x2d, *, alias_input):
    rows, lanes = x2d.shape
    itemsize = x2d.dtype.itemsize
    sublane_min = _SUBLANE_MIN.get(itemsize, 8)

    target_rows = max(
        sublane_min,
        (_TARGET_BLOCK_BYTES // (lanes * itemsize)) // sublane_min * sublane_min,
    )

    if rows <= target_rows:
        tile_rows = rows  # single full-array block; no alignment constraint applies
    else:
        # Cap the tile so the grid has a few steps (megacore), keep sublane-aligned.
        tile_rows = min(
            target_rows, _round_up(pl.cdiv(rows, _MIN_GRID_STEPS), sublane_min)
        )
        tile_rows = max(tile_rows, sublane_min)
    grid = pl.cdiv(rows, tile_rows)  # non-divisible grid: last block may be partial

    kwargs = {}
    if alias_input:
        kwargs["input_output_aliases"] = {0: 0}

    return pl.pallas_call(
        _lsb_forward_kernel,
        out_shape=jax.ShapeDtypeStruct((rows, lanes), x2d.dtype),
        grid=(grid,),
        in_specs=[pl.BlockSpec((tile_rows, lanes), lambda i: (i, 0))],
        out_specs=pl.BlockSpec((tile_rows, lanes), lambda i: (i, 0)),
        compiler_params=pltpu.CompilerParams(
            dimension_semantics=("parallel",),
            vmem_limit_bytes=32 * 1024 * 1024,
        ),
        **kwargs,
    )(x2d)


def stego_embedding_forward(image, text=""):
    """Pallas equivalent of StegoEmbeddingLayer.forward(image, text)."""
    del text  # see module header: the reference drops the embedded bit again
    if not jnp.issubdtype(image.dtype, jnp.integer):
        raise TypeError("reference semantics require a non-negative integer image")

    orig_shape = image.shape
    total = math.prod(orig_shape)

    # Fast path: lane-dense in-place view, no pad / slice / dtype-cast passes.
    for lanes in _LANE_CHOICES:
        if total % lanes == 0:
            x2d = image.reshape(total // lanes, lanes)
            out2d = _shift_2d(x2d, alias_input=True)
            return out2d.reshape(orig_shape)

    # Rare ragged fallback: pad the flat view to 128 lanes, slice afterwards.
    lanes = 128
    padded = _round_up(total, lanes)
    flat = jnp.pad(image.reshape(-1), (0, padded - total))
    out2d = _shift_2d(flat.reshape(padded // lanes, lanes), alias_input=False)
    return out2d.reshape(-1)[:total].reshape(orig_shape)


if __name__ == "__main__":
    key = jax.random.PRNGKey(0)

    # RGB image, 8-bit pixel values (native uint8 -> minimal HBM traffic).
    batch, channels, height, width = 2, 3, 16, 16
    image = jax.random.randint(
        key, (batch, channels, height, width), 0, 256, dtype=jnp.int32
    ).astype(jnp.uint8)
    text = "hidden message"  # interface parity only; provably cannot affect the output

    # Reference: every pixel becomes int(format(p,'08b')[:-1], 2) == p >> 1.
    expected = image // 2

    # `text` is stripped before jit (distinct strings never recompile).  The image
    # buffer is donated so the in-kernel input/output aliasing overwrites it in
    # place, mirroring the reference's in-place mutation.
    fwd = jax.jit(stego_embedding_forward, donate_argnums=(0,))
    out = jax.block_until_ready(fwd(image))
    del image  # donated

    assert out.shape == expected.shape, out.shape
    assert out.dtype == expected.dtype, out.dtype
    assert bool(jnp.all(out == expected))
    print("KERNEL_OK")
</pallas_src>

<mosaic_0001>
module attributes {stable_mosaic.version = 11 : i64} {
  func.func @_lsb_forward_kernel(%arg0: i32, %arg1: memref<3x512xi8, #tpu.memory_space<vmem>>, %arg2: memref<3x512xi8, #tpu.memory_space<vmem>>) attributes {dimension_semantics = [#tpu.dimension_semantics<parallel>], iteration_bounds = array<i64: 1>, scalar_prefetch = 0 : i64, scratch_operands = 0 : i64, tpu.core_type = #tpu.core_type<tc>, window_params = [{transform_indices = @transform_0, window_bounds = array<i64: 3, 512>}, {transform_indices = @transform_1, window_bounds = array<i64: 3, 512>}]} {
    %c0 = arith.constant 0 : index
    %c0_0 = arith.constant 0 : index
    %0 = vector.load %arg1[%c0, %c0_0] : memref<3x512xi8, #tpu.memory_space<vmem>>, vector<3x512xi8>
    %1 = arith.extui %0 : vector<3x512xi8> to vector<3x512xi32>
    %c1_i32 = arith.constant 1 : i32
    %2 = vector.broadcast %c1_i32 : i32 to vector<3x512xi32>
    %3 = arith.shrsi %1, %2 : vector<3x512xi32>
    %4 = arith.trunci %3 : vector<3x512xi32> to vector<3x512xi8>
    %c0_1 = arith.constant 0 : index
    %c0_2 = arith.constant 0 : index
    %5 = vector.load %arg2[%c0_1, %c0_2] : memref<3x512xi8, #tpu.memory_space<vmem>>, vector<3x512xi8>
    tpu.vector_store %arg2[%c0_1, %c0_2], %4 {strides = array<i32>} : memref<3x512xi8, #tpu.memory_space<vmem>>, vector<3x512xi8>,
    return
  }
  func.func @transform_0(%arg0: i32) -> (i32, i32) {
    %c0_i32 = arith.constant 0 : i32
    %c0_i32_0 = arith.constant 0 : i32
    return %arg0, %c0_i32 : i32, i32
  }
  func.func @transform_1(%arg0: i32) -> (i32, i32) {
    %c0_i32 = arith.constant 0 : i32
    %c0_i32_0 = arith.constant 0 : i32
    return %arg0, %c0_i32 : i32, i32
  }
}

</mosaic_0001>

<bundles_post_ra>
// kernel: stego_embedding_forward.1
= control target key start
LH: loop header
LB: loop body
LE: loop exit
PB: predicated region body
PF: predicated region fallthrough
CT: control target
= control target key end

     0   :  { %v30_v1 = vlaneseq  ;;  %vm49_vm0 = vcmask 1040384   ;;  %v74_v4 = vmov 1966171168   ;;  %vm50_vm1 = vsmask.f32 512  ;;  %s106_s0 = inlined_call_operand.vmem [shape: u8[3,512], index: 0, kind: input, shape index: {}, may-alias: {0,1}]   ;;  %s107_s1 = inlined_call_operand.vmem [shape: u8[3,512], index: 1, kind: output, shape index: {}, may-alias: {0,1}]  }
   0x1   :  { %v8_v0 = vld [vmem:[%s106_s0] sm:$0xf]  ;;  %v28_v5 = vunpack.c.l.s4 %v74_v4  ;;  %vm52_vm2 = vcmask 1041409   ;;  %vm53_vm3 = vsmask.f32 1536  ;;  %vm88_vm4 = vmand %vm49_vm0, %vm50_vm1  ;;  %vm56_vm6 = vcmask 1042434  }
   0x2   :  { %v9_v2 = vunpack.c.0.s8 %v8_v0  ;;  %v10_v3 = vunpack.c.1.s8 %v8_v0  ;;  %v31_v12 = vshrl.u32 %v30_v1, 7  ;;  %vm92_vm5 = vmand %vm52_vm2, %vm53_vm3  ;;  %vm57_vm7 = vsmask.f32 2560  ;;  %v64_v26 = vld [vmem:[%s107_s1] sm:$0xf] }
   0x3   :  { %v29_v11 = vunpack.c.0.s8 %v28_v5  ;;  %vm55_vm8 = vmor %vm92_vm5, %vm88_vm4  ;;  %vm60_vm10 = vcmask 1043459   ;;  %vm61_vm11 = vsmask.f32 3584 }
   0x4   :  { %v11_v6 = vand.u32 255, %v9_v2  ;;  %v12_v7 = vand.u32 255, %v10_v3  ;;  %vm58_vm9 = vmand %vm56_vm6, %vm57_vm7 }
   0x5   :  { %v32_v20 = vsub.s32 %v29_v11, %v31_v12  ;;  %vm59_vm12 = vmor %vm58_vm9, %vm55_vm8 }
   0x6   :  { %v13_v9 = vshra.s32 %v11_v6, 1  ;;  %v14_v10 = vshra.s32 %v12_v7, 1  ;;  %vm62_vm13 = vmand %vm60_vm10, %vm61_vm11 }
   0x7   :  { %vm63_vm14 = vmor %vm62_vm13, %vm59_vm12 }
   0x8   :  { %v15_v14 = vcombine.high %v13_v9, %v13_v9  ;;  %v16_v15 = vcombine.high %v14_v10, %v14_v10  ;;  %v17_v16 = vpack.c.b16 %v13_v9, %v13_v9  ;;  %v21_v17 = vpack.c.b16 %v14_v10, %v14_v10 }
   0xa   :  { %v19_v18 = vpack.c.b16 %v15_v14, %v15_v14  ;;  %v23_v19 = vpack.c.b16 %v16_v15, %v16_v15 }
   0xc   :  { %v71_v21 = vpack.c.b8 %v19_v18, %v17_v16  ;;  %v72_v22 = vpack.c.b8 %v23_v19, %v21_v17 }
   0xe   :  { %v33_v23 = vrot.slane %v71_v21, %v32_v20  ;;  %v40_v24 = vrot.slane %v72_v22, %v32_v20 }
  0x10   :  { %v41_v25 = vcombine.low %v33_v23, %v40_v24 }
  0x12   :  { %v48_v27 = vrot.slane %v41_v25, %v32_v20 }
  0x14   :  { %v65_v28 = vsel %vm63_vm14, %v48_v27, %v64_v26 }
  0x15   :  { %66 = vst [vmem:[%s107_s1] sm:$0xf] %v65_v28 }

</bundles_post_ra>
